<compile_context>
chip_gen: v5e
topology: v5e:2x2
jax: 0.10.0
libtpu: 0.0.40
codegen_flags: <defaults>
</compile_context>

<pallas_src>
import functools

import jax
import jax.numpy as jnp
from jax.experimental import pallas as pl
from jax.experimental.pallas import tpu as pltpu


def _round_up(v, m):
    return ((v + m - 1) // m) * m


def mlp_kernel(x_ref, w1_ref, b1_ref, w2_ref, b2_ref, w3_ref, b3_ref, o_ref):
    """relu(x@W1t + b1) -> relu(. @W2t + b2) -> . @W3t + b3, batch on sublanes.

    x_ref : (TB, S)      f32  batch tile, natural row-major layout
    w1_ref: (S,  H)      f32  (tiny K=6 matmul; kept f32)
    w2_ref: (H,  H)      bf16
    w3_ref: (H,  O)      bf16
    b*_ref: (1, H)/(1,O) f32  -- weights/biases VMEM-resident (constant index maps)
    o_ref : (TB, O)      f32
    """
    h1 = jnp.dot(x_ref[...], w1_ref[...], preferred_element_type=jnp.float32)
    h1 = jnp.maximum(h1 + b1_ref[...], 0.0)                      # (TB, H) f32
    h2 = jnp.dot(h1.astype(w2_ref.dtype), w2_ref[...],
                 preferred_element_type=jnp.float32)             # bf16 MXU, f32 acc
    h2 = jnp.maximum(h2 + b2_ref[...], 0.0)                      # (TB, H) f32
    out = jnp.dot(h2.astype(w3_ref.dtype), w3_ref[...],
                  preferred_element_type=jnp.float32)            # (TB, O) f32
    o_ref[...] = (out + b3_ref[...]).astype(o_ref.dtype)


@functools.partial(jax.jit, static_argnames=("tb",))
def neural_net_forward(x, kp, *, tb=2048):
    """x: (B, state_size) f32. kp: params from pad_params_for_kernel.
    Returns (B, out_dim) f32."""
    B, state = x.shape
    h_pad = kp["w2t"].shape[0]
    out_dim = kp["w3t"].shape[1]

    # Tile sizing: multiple of 128, large enough to amortize the ~0.35 us/step
    # pipeline overhead, and (when the batch allows) at most half the batch so
    # the grid has >=2 steps for v7x's 2-TensorCore sharding.
    tb = max(128, (tb // 128) * 128)
    b128 = _round_up(B, 128)
    tb_eff = min(tb, b128)
    if b128 >= 256:
        tb_eff = min(tb_eff, _round_up(b128 // 2, 128))
    b_pad = _round_up(B, tb_eff)

    # Row-only zero pad (identity / elided when B is already tile-aligned).
    # Unlike the previous version there is no transposed copy of x and no
    # output-side transpose; align the rollout batch to 128 to skip this too.
    x_p = x if b_pad == B else jnp.pad(x, ((0, b_pad - B), (0, 0)))
    grid = (b_pad // tb_eff,)

    def resident(shape):
        # Full-shape block + constant index map: DMA'd once, stays VMEM-resident.
        return pl.BlockSpec(shape, lambda i: (0, 0))

    flops = 2 * b_pad * (state * h_pad + h_pad * h_pad + h_pad * out_dim)
    bytes_accessed = (x_p.size * x_p.dtype.itemsize
                      + sum(int(v.size) * v.dtype.itemsize for v in kp.values())
                      + b_pad * out_dim * 4)

    out = pl.pallas_call(
        mlp_kernel,
        out_shape=jax.ShapeDtypeStruct((b_pad, out_dim), jnp.float32),
        grid=grid,
        in_specs=[
            pl.BlockSpec((tb_eff, state), lambda i: (i, 0)),   # x tile, natural layout
            resident(kp["w1t"].shape), resident(kp["b1"].shape),
            resident(kp["w2t"].shape), resident(kp["b2"].shape),
            resident(kp["w3t"].shape), resident(kp["b3"].shape),
        ],
        out_specs=pl.BlockSpec((tb_eff, out_dim), lambda i: (i, 0)),
        compiler_params=pltpu.CompilerParams(
            dimension_semantics=("parallel",),            # v7x: shard batch over 2 TCs
            vmem_limit_bytes=32 * 1024 * 1024),
        cost_estimate=pl.CostEstimate(
            flops=flops, transcendentals=0, bytes_accessed=bytes_accessed),
    )(x_p, kp["w1t"], kp["b1"], kp["w2t"], kp["b2"], kp["w3t"], kp["b3"])

    return out if b_pad == B else out[:B]


def init_params(key, state_size=6, hidden_size=64, variable_dimention=2):
    """torch.nn.Linear-style init: W (out,in), b (out,), U[-1/sqrt(fan_in), 1/sqrt(fan_in)]."""
    ks = jax.random.split(key, 6)

    def linear(kw, kb, fan_in, fan_out):
        bound = 1.0 / (fan_in ** 0.5)
        w = jax.random.uniform(kw, (fan_out, fan_in), jnp.float32, -bound, bound)
        b = jax.random.uniform(kb, (fan_out,), jnp.float32, -bound, bound)
        return w, b

    w1, b1 = linear(ks[0], ks[1], state_size, hidden_size)
    w2, b2 = linear(ks[2], ks[3], hidden_size, hidden_size)
    w3, b3 = linear(ks[4], ks[5], hidden_size, 2 * variable_dimention)
    return {"w1": w1, "b1": b1, "w2": w2, "b2": b2, "w3": w3, "b3": b3}


def pad_params_for_kernel(p, weight_dtype=jnp.bfloat16):
    """Transpose weights to MXU-native (in, out) layout, zero-pad hidden -> 128
    and cast the two hidden-size matrices to bf16.  Biases and the tiny layer-1
    weights stay f32; the kernel accumulates in f32.  Hidden is padded to exactly
    128 (no further -- extra zero-padding is dead FLOPs on the 256-wide MXUs).
    Zero pad rows/cols keep the padded hidden units exactly zero end-to-end."""
    hidden, state = p["w1"].shape
    out_dim = p["w3"].shape[0]
    h_pad = _round_up(hidden, 128)
    dh = h_pad - hidden

    w1t = jnp.pad(p["w1"].T, ((0, 0), (0, dh))).astype(jnp.float32)     # (S, H)
    b1 = jnp.pad(p["b1"], (0, dh)).reshape(1, h_pad).astype(jnp.float32)
    w2t = jnp.pad(p["w2"].T, ((0, dh), (0, dh))).astype(weight_dtype)   # (H, H)
    b2 = jnp.pad(p["b2"], (0, dh)).reshape(1, h_pad).astype(jnp.float32)
    w3t = jnp.pad(p["w3"].T, ((0, dh), (0, 0))).astype(weight_dtype)    # (H, O)
    b3 = p["b3"].reshape(1, out_dim).astype(jnp.float32)
    # TODO(synk): folding b1 into W1 (constant-1 input column) was skipped -- it
    # would force a wrapper-side copy of x; the bias add is free VPU filler.
    return {"w1t": w1t, "b1": b1, "w2t": w2t, "b2": b2, "w3t": w3t, "b3": b3}


def reference_forward(x, p):
    h1 = jnp.maximum(x @ p["w1"].T + p["b1"], 0.0)
    h2 = jnp.maximum(h1 @ p["w2"].T + p["b2"], 0.0)
    return h2 @ p["w3"].T + p["b3"]


if __name__ == "__main__":
    key = jax.random.PRNGKey(0)
    k_param, k1, k2, k3 = jax.random.split(key, 4)

    state_size, hidden_size, variable_dimention = 6, 64, 2
    out_dim = 2 * variable_dimention

    params = init_params(k_param, state_size, hidden_size, variable_dimention)
    kparams = pad_params_for_kernel(params)

    # bf16 weights on the two hidden matmuls -> compare vs f32 reference with a
    # correspondingly loose (but still wrong-kernel-catching) tolerance.
    tol = dict(atol=3e-2, rtol=3e-2)

    # 1) Tiny RL-style batch: single grid step, rows padded 8 -> 128.
    x = jax.random.normal(k1, (8, state_size), jnp.float32)
    out = jax.block_until_ready(neural_net_forward(x, kparams))
    assert out.shape == (8, out_dim)
    assert jnp.allclose(out, reference_forward(x, params), **tol)

    # 2) Tile-aligned batch: zero padding, 2 grid steps (v7x 2-TC sharding path).
    x = jax.random.normal(k2, (256, state_size), jnp.float32)
    out = jax.block_until_ready(neural_net_forward(x, kparams))
    assert out.shape == (256, out_dim)
    assert jnp.allclose(out, reference_forward(x, params), **tol)

    # 3) Non-multiple batch + small explicit tile: multi-step grid with
    #    VMEM-resident weights and row padding 300 -> 384.
    x = jax.random.normal(k3, (300, state_size), jnp.float32)
    out = jax.block_until_ready(neural_net_forward(x, kparams, tb=128))
    assert out.shape == (300, out_dim)
    assert jnp.allclose(out, reference_forward(x, params), **tol)

    print("KERNEL_OK")
</pallas_src>

<mosaic_0001>
module attributes {stable_mosaic.version = 11 : i64} {
  func.func @mlp_kernel(%arg0: i32, %arg1: memref<128x6xf32, #tpu.memory_space<vmem>>, %arg2: memref<6x128xf32, #tpu.memory_space<vmem>>, %arg3: memref<1x128xf32, #tpu.memory_space<vmem>>, %arg4: memref<128x128xbf16, #tpu.memory_space<vmem>>, %arg5: memref<1x128xf32, #tpu.memory_space<vmem>>, %arg6: memref<128x4xbf16, #tpu.memory_space<vmem>>, %arg7: memref<1x4xf32, #tpu.memory_space<vmem>>, %arg8: memref<128x4xf32, #tpu.memory_space<vmem>>) attributes {dimension_semantics = [#tpu.dimension_semantics<parallel>], iteration_bounds = array<i64: 1>, scalar_prefetch = 0 : i64, scratch_operands = 0 : i64, tpu.core_type = #tpu.core_type<tc>, window_params = [{transform_indices = @transform_0, window_bounds = array<i64: 128, 6>}, {pipeline_mode = #tpu.pipeline_mode<synchronous>, transform_indices = @transform_1, window_bounds = array<i64: 6, 128>}, {pipeline_mode = #tpu.pipeline_mode<synchronous>, transform_indices = @transform_2, window_bounds = array<i64: 1, 128>}, {pipeline_mode = #tpu.pipeline_mode<synchronous>, transform_indices = @transform_3, window_bounds = array<i64: 128, 128>}, {pipeline_mode = #tpu.pipeline_mode<synchronous>, transform_indices = @transform_4, window_bounds = array<i64: 1, 128>}, {pipeline_mode = #tpu.pipeline_mode<synchronous>, transform_indices = @transform_5, window_bounds = array<i64: 128, 4>}, {pipeline_mode = #tpu.pipeline_mode<synchronous>, transform_indices = @transform_6, window_bounds = array<i64: 1, 4>}, {transform_indices = @transform_7, window_bounds = array<i64: 128, 4>}]} {
    %c0 = arith.constant 0 : index
    %c0_0 = arith.constant 0 : index
    %0 = vector.load %arg1[%c0, %c0_0] : memref<128x6xf32, #tpu.memory_space<vmem>>, vector<128x6xf32>
    %c0_1 = arith.constant 0 : index
    %c0_2 = arith.constant 0 : index
    %1 = vector.load %arg2[%c0_1, %c0_2] : memref<6x128xf32, #tpu.memory_space<vmem>>, vector<6x128xf32>
    %cst = arith.constant dense<0.000000e+00> : vector<128x128xf32>
    %2 = tpu.matmul %0, %1, %cst {dimension_numbers = #tpu.dot_dimension_numbers<[1], [0], [0], [1], [0, 0, 1, 1], [], []>} : vector<128x6xf32>, vector<6x128xf32>, vector<128x128xf32> -> vector<128x128xf32>
    %c0_3 = arith.constant 0 : index
    %c0_4 = arith.constant 0 : index
    %3 = vector.load %arg3[%c0_3, %c0_4] : memref<1x128xf32, #tpu.memory_space<vmem>>, vector<1x128xf32>
    %4 = vector.broadcast %3 : vector<1x128xf32> to vector<128x128xf32>
    %5 = arith.addf %2, %4 : vector<128x128xf32>
    %cst_5 = arith.constant 0.000000e+00 : f32
    %6 = vector.broadcast %cst_5 : f32 to vector<128x128xf32>
    %7 = arith.maximumf %5, %6 : vector<128x128xf32>
    %8 = arith.truncf %7 : vector<128x128xf32> to vector<128x128xbf16>
    %c0_6 = arith.constant 0 : index
    %c0_7 = arith.constant 0 : index
    %9 = vector.load %arg4[%c0_6, %c0_7] : memref<128x128xbf16, #tpu.memory_space<vmem>>, vector<128x128xbf16>
    %cst_8 = arith.constant dense<0.000000e+00> : vector<128x128xf32>
    %10 = tpu.matmul %8, %9, %cst_8 {dimension_numbers = #tpu.dot_dimension_numbers<[1], [0], [0], [1], [0, 0, 1, 1], [], []>} : vector<128x128xbf16>, vector<128x128xbf16>, vector<128x128xf32> -> vector<128x128xf32>
    %c0_9 = arith.constant 0 : index
    %c0_10 = arith.constant 0 : index
    %11 = vector.load %arg5[%c0_9, %c0_10] : memref<1x128xf32, #tpu.memory_space<vmem>>, vector<1x128xf32>
    %12 = vector.broadcast %11 : vector<1x128xf32> to vector<128x128xf32>
    %13 = arith.addf %10, %12 : vector<128x128xf32>
    %cst_11 = arith.constant 0.000000e+00 : f32
    %14 = vector.broadcast %cst_11 : f32 to vector<128x128xf32>
    %15 = arith.maximumf %13, %14 : vector<128x128xf32>
    %16 = arith.truncf %15 : vector<128x128xf32> to vector<128x128xbf16>
    %c0_12 = arith.constant 0 : index
    %c0_13 = arith.constant 0 : index
    %17 = vector.load %arg6[%c0_12, %c0_13] : memref<128x4xbf16, #tpu.memory_space<vmem>>, vector<128x4xbf16>
    %cst_14 = arith.constant dense<0.000000e+00> : vector<128x4xf32>
    %18 = tpu.matmul %16, %17, %cst_14 {dimension_numbers = #tpu.dot_dimension_numbers<[1], [0], [0], [1], [0, 0, 1, 1], [], []>} : vector<128x128xbf16>, vector<128x4xbf16>, vector<128x4xf32> -> vector<128x4xf32>
    %c0_15 = arith.constant 0 : index
    %c0_16 = arith.constant 0 : index
    %19 = vector.load %arg7[%c0_15, %c0_16] : memref<1x4xf32, #tpu.memory_space<vmem>>, vector<1x4xf32>
    %20 = vector.broadcast %19 : vector<1x4xf32> to vector<128x4xf32>
    %21 = arith.addf %18, %20 : vector<128x4xf32>
    %c0_17 = arith.constant 0 : index
    %c0_18 = arith.constant 0 : index
    %22 = vector.load %arg8[%c0_17, %c0_18] : memref<128x4xf32, #tpu.memory_space<vmem>>, vector<128x4xf32>
    tpu.vector_store %arg8[%c0_17, %c0_18], %21 {strides = array<i32>} : memref<128x4xf32, #tpu.memory_space<vmem>>, vector<128x4xf32>,
    return
  }
  func.func @transform_0(%arg0: i32) -> (i32, i32) {
    %c0_i32 = arith.constant 0 : i32
    %c0_i32_0 = arith.constant 0 : i32
    return %arg0, %c0_i32 : i32, i32
  }
  func.func @transform_1(%arg0: i32) -> (i32, i32) {
    %c0_i32 = arith.constant 0 : i32
    %c0_i32_0 = arith.constant 0 : i32
    %c0_i32_1 = arith.constant 0 : i32
    return %c0_i32, %c0_i32_0 : i32, i32
  }
  func.func @transform_2(%arg0: i32) -> (i32, i32) {
    %c0_i32 = arith.constant 0 : i32
    %c0_i32_0 = arith.constant 0 : i32
    %c0_i32_1 = arith.constant 0 : i32
    return %c0_i32, %c0_i32_0 : i32, i32
  }
  func.func @transform_3(%arg0: i32) -> (i32, i32) {
    %c0_i32 = arith.constant 0 : i32
    %c0_i32_0 = arith.constant 0 : i32
    %c0_i32_1 = arith.constant 0 : i32
    return %c0_i32, %c0_i32_0 : i32, i32
  }
  func.func @transform_4(%arg0: i32) -> (i32, i32) {
    %c0_i32 = arith.constant 0 : i32
    %c0_i32_0 = arith.constant 0 : i32
    %c0_i32_1 = arith.constant 0 : i32
    return %c0_i32, %c0_i32_0 : i32, i32
  }
  func.func @transform_5(%arg0: i32) -> (i32, i32) {
    %c0_i32 = arith.constant 0 : i32
    %c0_i32_0 = arith.constant 0 : i32
    %c0_i32_1 = arith.constant 0 : i32
    return %c0_i32, %c0_i32_0 : i32, i32
  }
  func.func @transform_6(%arg0: i32) -> (i32, i32) {
    %c0_i32 = arith.constant 0 : i32
    %c0_i32_0 = arith.constant 0 : i32
    %c0_i32_1 = arith.constant 0 : i32
    return %c0_i32, %c0_i32_0 : i32, i32
  }
  func.func @transform_7(%arg0: i32) -> (i32, i32) {
    %c0_i32 = arith.constant 0 : i32
    %c0_i32_0 = arith.constant 0 : i32
    return %arg0, %c0_i32 : i32, i32
  }
}

</mosaic_0001>

<bundles_post_ra>
// kernel: neural_net_forward.1
= control target key start
LH: loop header
LB: loop body
LE: loop exit
PB: predicated region body
PF: predicated region fallthrough
CT: control target
= control target key end

     0   :  { %vm96_vm0 = vcmask 1045504   ;;  %vm47_vm1 = vcmask 48128   ;;  %vm447_vm2 = vcmask 31744   ;;  %s830_s1 = inlined_call_operand.vmem [shape: f32[6,128], index: 1, kind: input, shape index: {}]   ;;  %s831_s0 = inlined_call_operand.vmem [shape: f32[128,6], index: 0, kind: input, shape index: {}]   ;;  %s832_s2 = inlined_call_operand.vmem [shape: f32[1,128], index: 2, kind: input, shape index: {}]   ;;  %s833_s3 = inlined_call_operand.vmem [shape: bf16[128,128], index: 3, kind: input, shape index: {}]   ;;  %s834_s4 = inlined_call_operand.vmem [shape: f32[1,128], index: 4, kind: input, shape index: {}]   ;;  %s835_s5 = inlined_call_operand.vmem [shape: bf16[128,4], index: 5, kind: input, shape index: {}]   ;;  %s836_s6 = inlined_call_operand.vmem [shape: f32[1,4], index: 6, kind: input, shape index: {}]   ;;  %s837_s7 = inlined_call_operand.vmem [shape: f32[128,4], index: 7, kind: output, shape index: {}]  }
   0x1   :  { %v42_v0 = vld [vmem:[%s830_s1] sm:$0x3f]  ;;  %v27_v2 = vld [vmem:[%s831_s0 + $0x8] sm:$0xff]  ;;  %v28_v3 = vld [vmem:[%s831_s0 + $0x10] sm:$0xff] }
   0x2   :  { %v26_v1 = vld [vmem:[%s831_s0] sm:$0xff]  ;;  %468 = vmatpush.msk.msra.mxu0 %vm96_vm0, %v42_v0  ;;  %v29_v4 = vld [vmem:[%s831_s0 + $0x18] sm:$0xff]  ;;  %v31_v6 = vld [vmem:[%s831_s0 + $0x28] sm:$0xff] }
   0x3   :  { %469 = vmatmul.msk.f32.vlgmr.msra.gmra.mxu0 %vm47_vm1, %v26_v1  ;;  %v30_v5 = vld [vmem:[%s831_s0 + $0x20] sm:$0xff]  ;;  %v32_v7 = vld [vmem:[%s831_s0 + $0x30] sm:$0xff]  ;;  %v33_v8 = vld [vmem:[%s831_s0 + $0x38] sm:$0xff] }
   0x4   :  { %v34_v9 = vld [vmem:[%s831_s0 + $0x40] sm:$0xff]  ;;  %v35_v10 = vld [vmem:[%s831_s0 + $0x48] sm:$0xff]  ;;  %v556_v11 = vld [vmem:[%s833_s3 + $0x38] sm:$0xff] }
   0x5   :  { %257 = vmatpush.bf16.msra.mxu1 %v556_v11  ;;  %565 = vmatpush.bf16.msra.mxu3 %v556_v11  ;;  %v36_v12 = vld [vmem:[%s831_s0 + $0x50] sm:$0xff]  ;;  %v554_v14 = vld [vmem:[%s833_s3 + $0x28] sm:$0xff]  ;;  %v37_v15 = vld [vmem:[%s831_s0 + $0x58] sm:$0xff] }
   0x6   :  { %v555_v13 = vld [vmem:[%s833_s3 + $0x30] sm:$0xff]  ;;  %v553_v16 = vld [vmem:[%s833_s3 + $0x20] sm:$0xff]  ;;  %v552_v17 = vld [vmem:[%s833_s3 + $0x18] sm:$0xff] }
   0x7   :  { %v38_v18 = vld [vmem:[%s831_s0 + $0x60] sm:$0xff]  ;;  %v551_v19 = vld [vmem:[%s833_s3 + $0x10] sm:$0xff]  ;;  %v550_v20 = vld [vmem:[%s833_s3 + $0x8] sm:$0xff] }
   0x8   :  { %v39_v21 = vld [vmem:[%s831_s0 + $0x68] sm:$0xff]  ;;  %v549_v22 = vld [vmem:[%s833_s3] sm:$0xff]  ;;  %v40_v23 = vld [vmem:[%s831_s0 + $0x70] sm:$0xff] }
   0x9   :  { %258 = vmatpush.bf16.msra.mxu1 %v555_v13  ;;  %566 = vmatpush.bf16.msra.mxu3 %v555_v13  ;;  %v41_v24 = vld [vmem:[%s831_s0 + $0x78] sm:$0xff]  ;;  %v718_v26 = vld [vmem:[%s832_s2] ss:$0 sm:$0xff] }
   0xa   :  { %v564_v1 = vld [vmem:[%s835_s5 + $0x38] sm:$0xff] }
   0xb   :  { %470 = vmatmul.msk.f32.gmra.mxu0 %vm47_vm1, %v27_v2  ;;  %398 = vmatpush.bf16.msra.mxu2 %v564_v1 }
   0xd   :  { %259 = vmatpush.bf16.msra.mxu1 %v554_v14  ;;  %567 = vmatpush.bf16.msra.mxu3 %v554_v14 }
  0x11   :  { %260 = vmatpush.bf16.msra.mxu1 %v553_v16  ;;  %568 = vmatpush.bf16.msra.mxu3 %v553_v16  ;;  %v559_v16 = vld [vmem:[%s835_s5 + $0x10] sm:$0xff] }
  0x13   :  { %471 = vmatmul.msk.f32.gmra.mxu0 %vm47_vm1, %v28_v3 }
  0x15   :  { %261 = vmatpush.bf16.msra.mxu1 %v552_v17  ;;  %569 = vmatpush.bf16.msra.mxu3 %v552_v17 }
  0x19   :  { %262 = vmatpush.bf16.msra.mxu1 %v551_v19  ;;  %570 = vmatpush.bf16.msra.mxu3 %v551_v19  ;;  %v557_v19 = vld [vmem:[%s835_s5] sm:$0xff] }
  0x1b   :  { %472 = vmatmul.msk.f32.gmra.mxu0 %vm47_vm1, %v29_v4 }
  0x1d   :  { %263 = vmatpush.bf16.msra.mxu1 %v550_v20  ;;  %571 = vmatpush.bf16.msra.mxu3 %v550_v20 }
  0x21   :  { %264 = vmatpush.bf16.msra.mxu1 %v549_v22  ;;  %572 = vmatpush.bf16.msra.mxu3 %v549_v22 }
  0x23   :  { %473 = vmatmul.msk.f32.gmra.mxu0 %vm47_vm1, %v30_v5  ;;  %v563_v5 = vld [vmem:[%s835_s5 + $0x30] sm:$0xff] }
  0x24   :  { %399 = vmatpush.bf16.msra.mxu2 %v563_v5 }
  0x25   :  { %573 = vmatpush.bf16.msrb.mxu3 %v564_v1 }
  0x29   :  { %574 = vmatpush.bf16.msrb.mxu3 %v563_v5 }
  0x2b   :  { %474 = vmatmul.msk.f32.gmra.mxu0 %vm47_vm1, %v31_v6 }
  0x33   :  { %475 = vmatmul.msk.f32.gmra.mxu0 %vm47_vm1, %v32_v7  ;;  %v562_v7 = vld [vmem:[%s835_s5 + $0x28] sm:$0xff] }
  0x34   :  { %400 = vmatpush.bf16.msra.mxu2 %v562_v7  ;;  %575 = vmatpush.bf16.msrb.mxu3 %v562_v7 }
  0x3b   :  { %476 = vmatmul.msk.f32.gmra.mxu0 %vm47_vm1, %v33_v8  ;;  %v561_v8 = vld [vmem:[%s835_s5 + $0x20] sm:$0xff] }
  0x3c   :  { %401 = vmatpush.bf16.msra.mxu2 %v561_v8  ;;  %576 = vmatpush.bf16.msrb.mxu3 %v561_v8 }
  0x43   :  { %477 = vmatmul.msk.f32.gmra.mxu0 %vm47_vm1, %v34_v9 }
  0x4b   :  { %478 = vmatmul.msk.f32.gmra.mxu0 %vm47_vm1, %v35_v10 }
  0x53   :  { %479 = vmatmul.msk.f32.gmra.mxu0 %vm47_vm1, %v36_v12  ;;  %v560_v12 = vld [vmem:[%s835_s5 + $0x18] sm:$0xff] }
  0x54   :  { %402 = vmatpush.bf16.msra.mxu2 %v560_v12  ;;  %577 = vmatpush.bf16.msrb.mxu3 %v560_v12 }
  0x58   :  { %403 = vmatpush.bf16.msra.mxu2 %v559_v16  ;;  %578 = vmatpush.bf16.msrb.mxu3 %v559_v16 }
  0x5b   :  { %480 = vmatmul.msk.f32.gmra.mxu0 %vm47_vm1, %v37_v15 }
  0x63   :  { %481 = vmatmul.msk.f32.gmra.mxu0 %vm47_vm1, %v38_v18  ;;  %v558_v18 = vld [vmem:[%s835_s5 + $0x8] sm:$0xff] }
  0x64   :  { %404 = vmatpush.bf16.msra.mxu2 %v558_v18  ;;  %579 = vmatpush.bf16.msrb.mxu3 %v558_v18 }
  0x68   :  { %405 = vmatpush.bf16.msra.mxu2 %v557_v19  ;;  %580 = vmatpush.bf16.msrb.mxu3 %v557_v19  ;;  %v583_v19 = vld [vmem:[%s836_s6] ss:$0 sm:$0xff] }
  0x6b   :  { %482 = vmatmul.msk.f32.gmra.mxu0 %vm47_vm1, %v39_v21 }
  0x73   :  { %483 = vmatmul.msk.f32.gmra.mxu0 %vm47_vm1, %v40_v23 }
  0x7b   :  { %484 = vmatmul.msk.f32.gmra.mxu0 %vm47_vm1, %v41_v24 }
  0x80   :  { %v117_v25 = vpop.f32.mrf.mxu0 }
  0x81   :  { %v118_v27 = vadd.f32 %v718_v26, %v117_v25 }
  0x83   :  { %v165_v30 = vmax.f32 %v118_v27, 0.0 }
  0x88   :  { %v120_v28 = vpop.f32.mrf.mxu0 }
  0x89   :  { %v121_v29 = vadd.f32 %v718_v26, %v120_v28  ;;  %v582_v28 = vld [vmem:[%s834_s4] ss:$0 sm:$0xff] }
  0x8b   :  { %v166_v31 = vmax.f32 %v121_v29, 0.0 }
  0x8d   :  { %v181_v32 = vpack.c.bf16 %v166_v31, %v165_v30 }
  0x8f   :  { %265 = vmatmul.bf16.vlgmr.msra.gmra.mxu1 %v181_v32 }
  0x90   :  { %v123_v33 = vpop.f32.mrf.mxu0 }
  0x91   :  { %v124_v34 = vadd.f32 %v718_v26, %v123_v33 }
  0x93   :  { %v167_v37 = vmax.f32 %v124_v34, 0.0 }
  0x98   :  { %v126_v35 = vpop.f32.mrf.mxu0 }
  0x99   :  { %v127_v36 = vadd.f32 %v718_v26, %v126_v35 }
  0x9b   :  { %v168_v38 = vmax.f32 %v127_v36, 0.0 }
  0x9d   :  { %v182_v39 = vpack.c.bf16 %v168_v38, %v167_v37 }
  0x9f   :  { %270 = vmatmul.bf16.gmra.mxu1 %v182_v39 }
  0xa0   :  { %v129_v40 = vpop.f32.mrf.mxu0 }
  0xa1   :  { %v130_v41 = vadd.f32 %v718_v26, %v129_v40 }
  0xa3   :  { %v169_v44 = vmax.f32 %v130_v41, 0.0 }
  0xa8   :  { %v132_v42 = vpop.f32.mrf.mxu0 }
  0xa9   :  { %v133_v43 = vadd.f32 %v718_v26, %v132_v42 }
  0xab   :  { %v170_v45 = vmax.f32 %v133_v43, 0.0 }
  0xad   :  { %v183_v46 = vpack.c.bf16 %v170_v45, %v169_v44 }
  0xaf   :  { %275 = vmatmul.bf16.gmra.mxu1 %v183_v46 }
  0xb0   :  { %v135_v47 = vpop.f32.mrf.mxu0 }
  0xb1   :  { %v136_v48 = vadd.f32 %v718_v26, %v135_v47 }
  0xb3   :  { %v171_v51 = vmax.f32 %v136_v48, 0.0 }
  0xb8   :  { %v138_v49 = vpop.f32.mrf.mxu0 }
  0xb9   :  { %v139_v50 = vadd.f32 %v718_v26, %v138_v49 }
  0xbb   :  { %v172_v52 = vmax.f32 %v139_v50, 0.0 }
  0xbd   :  { %v184_v53 = vpack.c.bf16 %v172_v52, %v171_v51 }
  0xbf   :  { %280 = vmatmul.bf16.gmra.mxu1 %v184_v53 }
  0xc0   :  { %v141_v54 = vpop.f32.mrf.mxu0 }
  0xc1   :  { %v142_v55 = vadd.f32 %v718_v26, %v141_v54 }
  0xc3   :  { %v173_v58 = vmax.f32 %v142_v55, 0.0 }
  0xc8   :  { %v144_v56 = vpop.f32.mrf.mxu0 }
  0xc9   :  { %v145_v57 = vadd.f32 %v718_v26, %v144_v56 }
  0xcb   :  { %v174_v59 = vmax.f32 %v145_v57, 0.0 }
  0xcd   :  { %v185_v60 = vpack.c.bf16 %v174_v59, %v173_v58 }
  0xcf   :  { %285 = vmatmul.bf16.gmra.mxu1 %v185_v60 }
  0xd0   :  { %v147_v61 = vpop.f32.mrf.mxu0 }
  0xd1   :  { %v148_v62 = vadd.f32 %v718_v26, %v147_v61 }
  0xd3   :  { %v175_v2 = vmax.f32 %v148_v62, 0.0 }
  0xd8   :  { %v150_v63 = vpop.f32.mrf.mxu0 }
  0xd9   :  { %v151_v0 = vadd.f32 %v718_v26, %v150_v63 }
  0xdb   :  { %v176_v3 = vmax.f32 %v151_v0, 0.0 }
  0xdd   :  { %v186_v4 = vpack.c.bf16 %v176_v3, %v175_v2 }
  0xdf   :  { %290 = vmatmul.bf16.gmra.mxu1 %v186_v4 }
  0xe0   :  { %v153_v6 = vpop.f32.mrf.mxu0 }
  0xe1   :  { %v154_v9 = vadd.f32 %v718_v26, %v153_v6 }
  0xe3   :  { %v177_v13 = vmax.f32 %v154_v9, 0.0 }
  0xe8   :  { %v156_v10 = vpop.f32.mrf.mxu0 }
  0xe9   :  { %v157_v11 = vadd.f32 %v718_v26, %v156_v10 }
  0xeb   :  { %v178_v14 = vmax.f32 %v157_v11, 0.0 }
  0xed   :  { %v187_v15 = vpack.c.bf16 %v178_v14, %v177_v13 }
  0xef   :  { %295 = vmatmul.bf16.vlgmr.msra.gmra.mxu3 %v187_v15 }
  0xf0   :  { %v159_v17 = vpop.f32.mrf.mxu0 }
  0xf1   :  { %v160_v20 = vadd.f32 %v718_v26, %v159_v17 }
  0xf3   :  { %v179_v23 = vmax.f32 %v160_v20, 0.0 }
  0xf8   :  { %v162_v21 = vpop.f32.mrf.mxu0 }
  0xf9   :  { %v163_v22 = vadd.f32 %v718_v26, %v162_v21 }
  0xfb   :  { %v180_v24 = vmax.f32 %v163_v22, 0.0 }
  0xfd   :  { %v188_v25 = vpack.c.bf16 %v180_v24, %v179_v23 }
  0xff   :  { %300 = vmatmul.bf16.gmra.mxu3 %v188_v25 }
 0x10c   :  { %v266_v27 = vpop.f32.mrf.mxu1 }
 0x10d   :  { %v267_v29 = vadd.f32 %v582_v28, %v266_v27 }
 0x10f   :  { %v306_v32 = vmax.f32 %v267_v29, 0.0 }
 0x114   :  { %v268_v30 = vpop.f32.mrf.mxu1 }
 0x115   :  { %v269_v31 = vadd.f32 %v582_v28, %v268_v30 }
 0x117   :  { %v307_v33 = vmax.f32 %v269_v31, 0.0 }
 0x119   :  { %v322_v34 = vpack.c.bf16 %v307_v33, %v306_v32 }
 0x11b   :  { %406 = vmatmul.bf16.vlgmr.msra.gmra.mxu2 %v322_v34 }
 0x11c   :  { %v271_v35 = vpop.f32.mrf.mxu1 }
 0x11d   :  { %v272_v36 = vadd.f32 %v582_v28, %v271_v35 }
 0x11f   :  { %v308_v38 = vmax.f32 %v272_v36, 0.0 }
 0x124   :  { %v273_v37 = vpop.f32.mrf.mxu1 }
 0x125   :  { %v274_v26 = vadd.f32 %v582_v28, %v273_v37 }
 0x127   :  { %v309_v39 = vmax.f32 %v274_v26, 0.0 }
 0x129   :  { %v323_v40 = vpack.c.bf16 %v309_v39, %v308_v38 }
 0x12b   :  { %411 = vmatmul.bf16.gmra.mxu2 %v323_v40 }
 0x12c   :  { %v276_v41 = vpop.f32.mrf.mxu1 }
 0x12d   :  { %v277_v42 = vadd.f32 %v582_v28, %v276_v41 }
 0x12f   :  { %v310_v45 = vmax.f32 %v277_v42, 0.0 }
 0x134   :  { %v278_v43 = vpop.f32.mrf.mxu1 }
 0x135   :  { %v279_v44 = vadd.f32 %v582_v28, %v278_v43 }
 0x137   :  { %v311_v46 = vmax.f32 %v279_v44, 0.0 }
 0x139   :  { %v324_v47 = vpack.c.bf16 %v311_v46, %v310_v45 }
 0x13b   :  { %416 = vmatmul.bf16.gmra.mxu2 %v324_v47 }
 0x13c   :  { %v281_v48 = vpop.f32.mrf.mxu1 }
 0x13d   :  { %v282_v49 = vadd.f32 %v582_v28, %v281_v48 }
 0x13f   :  { %v312_v52 = vmax.f32 %v282_v49, 0.0 }
 0x144   :  { %v283_v50 = vpop.f32.mrf.mxu1 }
 0x145   :  { %v284_v51 = vadd.f32 %v582_v28, %v283_v50 }
 0x147   :  { %v313_v53 = vmax.f32 %v284_v51, 0.0 }
 0x149   :  { %v325_v54 = vpack.c.bf16 %v313_v53, %v312_v52 }
 0x14b   :  { %421 = vmatmul.bf16.gmra.mxu2 %v325_v54 }
 0x14c   :  { %v286_v55 = vpop.f32.mrf.mxu1 }
 0x14d   :  { %v287_v56 = vadd.f32 %v582_v28, %v286_v55 }
 0x14f   :  { %v314_v59 = vmax.f32 %v287_v56, 0.0 }
 0x154   :  { %v288_v57 = vpop.f32.mrf.mxu1 }
 0x155   :  { %v289_v58 = vadd.f32 %v582_v28, %v288_v57 }
 0x157   :  { %v315_v60 = vmax.f32 %v289_v58, 0.0 }
 0x159   :  { %v326_v61 = vpack.c.bf16 %v315_v60, %v314_v59 }
 0x15b   :  { %426 = vmatmul.bf16.gmra.mxu2 %v326_v61 }
 0x15c   :  { %v291_v62 = vpop.f32.mrf.mxu1 }
 0x15d   :  { %v292_v63 = vadd.f32 %v582_v28, %v291_v62 }
 0x15f   :  { %v316_v2 = vmax.f32 %v292_v63, 0.0 }
 0x164   :  { %v293_v0 = vpop.f32.mrf.mxu1 }
 0x165   :  { %v294_v1 = vadd.f32 %v582_v28, %v293_v0 }
 0x167   :  { %v317_v3 = vmax.f32 %v294_v1, 0.0 }
 0x169   :  { %v327_v4 = vpack.c.bf16 %v317_v3, %v316_v2 }
 0x16b   :  { %431 = vmatmul.bf16.gmra.mxu2 %v327_v4 }
 0x172   :  { %v296_v5 = vpop.f32.mrf.mxu3 }
 0x173   :  { %v297_v6 = vadd.f32 %v582_v28, %v296_v5 }
 0x175   :  { %v318_v9 = vmax.f32 %v297_v6, 0.0 }
 0x17a   :  { %v298_v7 = vpop.f32.mrf.mxu3 }
 0x17b   :  { %v299_v8 = vadd.f32 %v582_v28, %v298_v7 }
 0x17d   :  { %v319_v10 = vmax.f32 %v299_v8, 0.0 }
 0x17f   :  { %v328_v11 = vpack.c.bf16 %v319_v10, %v318_v9 }
 0x181   :  { %436 = vmatmul.bf16.vlgmr.msrb.gmra.mxu3 %v328_v11 }
 0x182   :  { %v301_v12 = vpop.f32.mrf.mxu3 }
 0x183   :  { %v302_v13 = vadd.f32 %v582_v28, %v301_v12 }
 0x185   :  { %v320_v16 = vmax.f32 %v302_v13, 0.0 }
 0x18a   :  { %v303_v14 = vpop.f32.mrf.mxu3 }
 0x18b   :  { %v304_v15 = vadd.f32 %v582_v28, %v303_v14 }
 0x18d   :  { %v321_v17 = vmax.f32 %v304_v15, 0.0 }
 0x18f   :  { %v329_v18 = vpack.c.bf16 %v321_v17, %v320_v16 }
 0x191   :  { %441 = vmatmul.bf16.gmra.mxu3 %v329_v18 }
 0x19e   :  { %v407_v20 = vpop.f32.mrf.mxu2 }
 0x19f   :  { %v408_v21 = vadd.f32 %v583_v19, %v407_v20 }
 0x1a1   :  { %448 = vst.msk [vmem:[%s837_s7] sm:$0xff] %vm447_vm2, %v408_v21 }
 0x1a6   :  { %v409_v22 = vpop.f32.mrf.mxu2 }
 0x1a7   :  { %v410_v23 = vadd.f32 %v583_v19, %v409_v22 }
 0x1a9   :  { %449 = vst.msk [vmem:[%s837_s7 + $0x8] sm:$0xff] %vm447_vm2, %v410_v23 }
 0x1ae   :  { %v412_v24 = vpop.f32.mrf.mxu2 }
 0x1af   :  { %v413_v25 = vadd.f32 %v583_v19, %v412_v24 }
 0x1b1   :  { %450 = vst.msk [vmem:[%s837_s7 + $0x10] sm:$0xff] %vm447_vm2, %v413_v25 }
 0x1b6   :  { %v414_v27 = vpop.f32.mrf.mxu2 }
 0x1b7   :  { %v415_v28 = vadd.f32 %v583_v19, %v414_v27 }
 0x1b9   :  { %451 = vst.msk [vmem:[%s837_s7 + $0x18] sm:$0xff] %vm447_vm2, %v415_v28 }
 0x1be   :  { %v417_v29 = vpop.f32.mrf.mxu2 }
 0x1bf   :  { %v418_v30 = vadd.f32 %v583_v19, %v417_v29 }
 0x1c1   :  { %452 = vst.msk [vmem:[%s837_s7 + $0x20] sm:$0xff] %vm447_vm2, %v418_v30 }
 0x1c6   :  { %v419_v31 = vpop.f32.mrf.mxu2 }
 0x1c7   :  { %v420_v32 = vadd.f32 %v583_v19, %v419_v31 }
 0x1c9   :  { %453 = vst.msk [vmem:[%s837_s7 + $0x28] sm:$0xff] %vm447_vm2, %v420_v32 }
 0x1ce   :  { %v422_v33 = vpop.f32.mrf.mxu2 }
 0x1cf   :  { %v423_v34 = vadd.f32 %v583_v19, %v422_v33 }
 0x1d1   :  { %454 = vst.msk [vmem:[%s837_s7 + $0x30] sm:$0xff] %vm447_vm2, %v423_v34 }
 0x1d6   :  { %v424_v35 = vpop.f32.mrf.mxu2 }
 0x1d7   :  { %v425_v36 = vadd.f32 %v583_v19, %v424_v35 }
 0x1d9   :  { %455 = vst.msk [vmem:[%s837_s7 + $0x38] sm:$0xff] %vm447_vm2, %v425_v36 }
 0x1de   :  { %v427_v37 = vpop.f32.mrf.mxu2 }
 0x1df   :  { %v428_v26 = vadd.f32 %v583_v19, %v427_v37 }
 0x1e1   :  { %456 = vst.msk [vmem:[%s837_s7 + $0x40] sm:$0xff] %vm447_vm2, %v428_v26 }
 0x1e6   :  { %v429_v38 = vpop.f32.mrf.mxu2 }
 0x1e7   :  { %v430_v39 = vadd.f32 %v583_v19, %v429_v38 }
 0x1e9   :  { %457 = vst.msk [vmem:[%s837_s7 + $0x48] sm:$0xff] %vm447_vm2, %v430_v39 }
 0x1ee   :  { %v432_v40 = vpop.f32.mrf.mxu2 }
 0x1ef   :  { %v433_v41 = vadd.f32 %v583_v19, %v432_v40 }
 0x1f1   :  { %458 = vst.msk [vmem:[%s837_s7 + $0x50] sm:$0xff] %vm447_vm2, %v433_v41 }
 0x1f6   :  { %v434_v42 = vpop.f32.mrf.mxu2 }
 0x1f7   :  { %v435_v43 = vadd.f32 %v583_v19, %v434_v42 }
 0x1f9   :  { %459 = vst.msk [vmem:[%s837_s7 + $0x58] sm:$0xff] %vm447_vm2, %v435_v43 }
 0x204   :  { %v437_v44 = vpop.f32.mrf.mxu3 }
 0x205   :  { %v438_v45 = vadd.f32 %v583_v19, %v437_v44 }
 0x207   :  { %460 = vst.msk [vmem:[%s837_s7 + $0x60] sm:$0xff] %vm447_vm2, %v438_v45 }
 0x20c   :  { %v439_v46 = vpop.f32.mrf.mxu3 }
 0x20d   :  { %v440_v47 = vadd.f32 %v583_v19, %v439_v46 }
 0x20f   :  { %461 = vst.msk [vmem:[%s837_s7 + $0x68] sm:$0xff] %vm447_vm2, %v440_v47 }
 0x214   :  { %v442_v48 = vpop.f32.mrf.mxu3 }
 0x215   :  { %v443_v49 = vadd.f32 %v583_v19, %v442_v48 }
 0x217   :  { %462 = vst.msk [vmem:[%s837_s7 + $0x70] sm:$0xff] %vm447_vm2, %v443_v49 }
 0x21c   :  { %v444_v50 = vpop.f32.mrf.mxu3 }
 0x21d   :  { %v445_v51 = vadd.f32 %v583_v19, %v444_v50 }
 0x21f   :  { %463 = vst.msk [vmem:[%s837_s7 + $0x78] sm:$0xff] %vm447_vm2, %v445_v51 }

</bundles_post_ra>
